<compile_context>
chip_gen: v7x
topology: tpu7x:2x2x1
jax: 0.10.0
libtpu: 0.0.40
codegen_flags: <defaults>
</compile_context>

<pallas_src>
import functools

import jax
import jax.numpy as jnp
from jax import lax
from jax.experimental import pallas as pl
from jax.experimental.pallas import tpu as pltpu

HIDDEN = 40


def hard_mlp_kernel(x_ref, w1_ref, b1_ref, w2_ref, b2_ref, w3x_ref, b3_ref,
                    o_ref, *, sub_b, vpu_out):
    in_dim, block_b = x_ref.shape
    out_dim = o_ref.shape[0]
    nsub = block_b // sub_b

    # Weights/biases: constant index_map -> one DMA, load once, reused by all slabs.
    w1 = w1_ref[...]        # [HIDDEN, in_dim]
    b1 = b1_ref[...]        # [HIDDEN, 1]
    w2 = w2_ref[...]        # [HIDDEN, HIDDEN]
    b2 = b2_ref[...]        # [HIDDEN, 1]
    w3x = w3x_ref[...]      # [HIDDEN, out_dim] if vpu_out else [out_dim, HIDDEN]
    b3 = b3_ref[...]        # [out_dim, 1]

    def body(j, carry):
        c0 = pl.multiple_of(j * sub_b, 128)
        x = x_ref[:, pl.ds(c0, sub_b)]                 # [in_dim, sub_b]

        xc = x[0:1, :]                                 # 'x' coordinate, [1, sub_b]
        yc = x[1:2, :]                                 # 'y' coordinate, [1, sub_b]
        hard = xc * (1.0 - xc) * yc * (1.0 - yc)       # [1, sub_b]

        # Layer 1: K = in_dim (tiny) -> unrolled VPU broadcast-FMAs, skip MXU.
        h1 = b1
        for k in range(in_dim):                        # static unroll
            h1 = h1 + w1[:, k:k + 1] * x[k:k + 1, :]
        h1 = jnp.maximum(h1, 0.0)                      # [HIDDEN, sub_b]

        # Layer 2: MXU matmul; N = sub_b lands on lanes (dense 128-wide).
        h2 = jnp.dot(w2, h1, preferred_element_type=jnp.float32) + b2
        h2 = jnp.maximum(h2, 0.0)                      # [HIDDEN, sub_b]

        # Layer 3.
        if vpu_out:
            # M = out_dim (tiny): VPU multiply + sublane/XLU reduction, no MXU pass.
            rows = [jnp.sum(w3x[:, o:o + 1] * h2, axis=0, keepdims=True)
                    for o in range(out_dim)]
            y = rows[0] if out_dim == 1 else jnp.concatenate(rows, axis=0)
            y = y + b3                                 # [out_dim, sub_b]
        else:
            y = jnp.dot(w3x, h2, preferred_element_type=jnp.float32) + b3

        o_ref[:, pl.ds(c0, sub_b)] = (hard * y).astype(o_ref.dtype)
        return carry

    lax.fori_loop(0, nsub, body, 0, unroll=True)


def _hard_mlp_call(x_t, w1, b1, w2, b2, w3x, b3, *, block_b, sub_b, vpu_out):
    in_dim, padded_B = x_t.shape
    hidden = w1.shape[0]
    out_dim = b3.shape[0]
    grid = (padded_B // block_b,)

    rep = lambda shape: pl.BlockSpec(shape, lambda i: (0, 0))  # small, replicated

    flops = 2 * padded_B * (in_dim * hidden + hidden * hidden + hidden * out_dim)
    n_params = int(w1.size + b1.size + w2.size + b2.size + w3x.size + b3.size)
    bytes_accessed = 4 * (padded_B * (in_dim + out_dim) + n_params)

    kernel = functools.partial(hard_mlp_kernel, sub_b=sub_b, vpu_out=vpu_out)

    return pl.pallas_call(
        kernel,
        out_shape=jax.ShapeDtypeStruct((out_dim, padded_B), jnp.float32),
        grid_spec=pltpu.PrefetchScalarGridSpec(
            num_scalar_prefetch=0,
            grid=grid,
            in_specs=[
                pl.BlockSpec((in_dim, block_b), lambda i: (0, i)),   # x^T batch tile
                rep(tuple(w1.shape)),
                rep(tuple(b1.shape)),
                rep(tuple(w2.shape)),
                rep(tuple(b2.shape)),
                rep(tuple(w3x.shape)),
                rep(tuple(b3.shape)),
            ],
            out_specs=pl.BlockSpec((out_dim, block_b), lambda i: (0, i)),
        ),
        compiler_params=pltpu.CompilerParams(
            dimension_semantics=("parallel",),   # batch tiles split across TCs (v7x)
        ),
        cost_estimate=pl.CostEstimate(
            flops=flops, transcendentals=0, bytes_accessed=bytes_accessed),
    )(x_t, w1, b1, w2, b2, w3x, b3)


def _pick_sub_b(block_b):
    # Largest divisor of block_b that is a multiple of 128 and <= 512 lanes.
    m = block_b // 128
    for s in (4, 3, 2, 1):
        if m % s == 0:
            return 128 * s
    return 128


def _choose_tiling(B, max_block_b):
    # Lane-dense batch tile: multiple of 128, capped at max_block_b, no gross
    # over-padding of small batches, and >=2 grid steps when the batch allows it
    # (so v7x's two TensorCores both get work via the "parallel" grid axis).
    lanes = 128 * pl.cdiv(B, 128)                       # minimal lane-dense batch
    bb = max(128, (min(max_block_b, lanes) // 128) * 128)
    if lanes > 128 and pl.cdiv(B, bb) < 2:
        bb = 128 * pl.cdiv(lanes // 128, 2)             # split into ~2 tiles
    padded_B = bb * pl.cdiv(B, bb)
    return bb, _pick_sub_b(bb), padded_B


@functools.partial(jax.jit, static_argnames=("block_b",))
def hard_mlp(x, w1, b1, w2, b2, w3, b3, *, block_b=2048):
    """x: [B, in_dim] (PyTorch layout). Weights PyTorch-style [out, in], biases [out, 1]."""
    B, in_dim = x.shape
    out_dim = w3.shape[0]
    bb, sub_b, padded_B = _choose_tiling(B, block_b)

    # Fused transpose + zero-pad into the lane-dense [in_dim, padded_B] layout the
    # kernel wants (single HBM copy). Padded columns are zeros -> hard = 0, sliced off.
    x_t = jnp.pad(x.astype(jnp.float32).T, ((0, 0), (0, padded_B - B)))

    vpu_out = out_dim <= 4
    w3x = w3.T if vpu_out else w3          # [HIDDEN, out_dim] for the VPU layer-3 path

    y_t = _hard_mlp_call(x_t, w1, b1, w2, b2, w3x, b3,
                         block_b=bb, sub_b=sub_b, vpu_out=vpu_out)

    if out_dim == 1:
        return y_t[0, :B].reshape(B, 1)    # metadata reshape, no HBM transpose
    return y_t[:, :B].T


def init_linear(key, fan_in, fan_out):
    # PyTorch-style init: U(-1/sqrt(fan_in), 1/sqrt(fan_in)),
    # weight shape [out_features, in_features], bias shape [out_features, 1].
    kw, kb = jax.random.split(key)
    bound = 1.0 / jnp.sqrt(float(fan_in))
    w = jax.random.uniform(kw, (fan_out, fan_in), jnp.float32, -bound, bound)
    b = jax.random.uniform(kb, (fan_out, 1), jnp.float32, -bound, bound)
    return w, b


def reference(x, w1, b1, w2, b2, w3, b3):
    xc, yc = x[:, 0:1], x[:, 1:2]
    hard = xc * (1 - xc) * yc * (1 - yc)
    h1 = jnp.maximum(x @ w1.T + b1.T, 0.0)
    h2 = jnp.maximum(h1 @ w2.T + b2.T, 0.0)
    return hard * (h2 @ w3.T + b3.T)


if __name__ == "__main__":
    key = jax.random.PRNGKey(0)
    k_x, k1, k2, k3 = jax.random.split(key, 4)

    batch, input_dim, output_dim = 16, 2, 1   # x.extract(['x'])/['y'] -> 2 input coords

    x = jax.random.uniform(k_x, (batch, input_dim), jnp.float32)  # coords in [0, 1)
    w1, b1 = init_linear(k1, input_dim, HIDDEN)
    w2, b2 = init_linear(k2, HIDDEN, HIDDEN)
    w3, b3 = init_linear(k3, HIDDEN, output_dim)

    # Small batch: single 128-lane tile.
    out = jax.block_until_ready(hard_mlp(x, w1, b1, w2, b2, w3, b3))
    ref = reference(x, w1, b1, w2, b2, w3, b3)
    assert out.shape == (batch, output_dim)
    assert jnp.allclose(out, ref, atol=1e-5, rtol=1e-4), "mismatch vs reference (small)"

    # Medium batch with tail padding: 2 grid steps (exercises the 'parallel' split).
    x_med = jax.random.uniform(jax.random.PRNGKey(1), (300, input_dim), jnp.float32)
    out_med = jax.block_until_ready(hard_mlp(x_med, w1, b1, w2, b2, w3, b3))
    ref_med = reference(x_med, w1, b1, w2, b2, w3, b3)
    assert out_med.shape == (300, output_dim)
    assert jnp.allclose(out_med, ref_med, atol=1e-5, rtol=1e-4), "mismatch vs reference (medium)"

    # Larger batch: full 2048-lane tiles, 4-slab inner loop, plus tail padding.
    x_big = jax.random.uniform(jax.random.PRNGKey(2), (3000, input_dim), jnp.float32)
    out_big = jax.block_until_ready(hard_mlp(x_big, w1, b1, w2, b2, w3, b3))
    ref_big = reference(x_big, w1, b1, w2, b2, w3, b3)
    assert out_big.shape == (3000, output_dim)
    assert jnp.allclose(out_big, ref_big, atol=1e-5, rtol=1e-4), "mismatch vs reference (big)"

    print("KERNEL_OK")
</pallas_src>

<mosaic_0001>
module attributes {stable_mosaic.version = 11 : i64} {
  func.func @hard_mlp_kernel(%arg0: i32, %arg1: memref<2x128xf32, #tpu.memory_space<vmem>>, %arg2: memref<40x2xf32, #tpu.memory_space<vmem>>, %arg3: memref<40x1xf32, #tpu.memory_space<vmem>>, %arg4: memref<40x40xf32, #tpu.memory_space<vmem>>, %arg5: memref<40x1xf32, #tpu.memory_space<vmem>>, %arg6: memref<40x1xf32, #tpu.memory_space<vmem>>, %arg7: memref<1x1xf32, #tpu.memory_space<vmem>>, %arg8: memref<1x128xf32, #tpu.memory_space<vmem>>) attributes {dimension_semantics = [#tpu.dimension_semantics<parallel>], iteration_bounds = array<i64: 1>, scalar_prefetch = 0 : i64, scratch_operands = 0 : i64, tpu.core_type = #tpu.core_type<tc>, window_params = [{transform_indices = @transform_0, window_bounds = array<i64: 2, 128>}, {pipeline_mode = #tpu.pipeline_mode<synchronous>, transform_indices = @transform_1, window_bounds = array<i64: 40, 2>}, {pipeline_mode = #tpu.pipeline_mode<synchronous>, transform_indices = @transform_2, window_bounds = array<i64: 40, 1>}, {pipeline_mode = #tpu.pipeline_mode<synchronous>, transform_indices = @transform_3, window_bounds = array<i64: 40, 40>}, {pipeline_mode = #tpu.pipeline_mode<synchronous>, transform_indices = @transform_4, window_bounds = array<i64: 40, 1>}, {pipeline_mode = #tpu.pipeline_mode<synchronous>, transform_indices = @transform_5, window_bounds = array<i64: 40, 1>}, {pipeline_mode = #tpu.pipeline_mode<synchronous>, transform_indices = @transform_6, window_bounds = array<i64: 1, 1>}, {transform_indices = @transform_7, window_bounds = array<i64: 1, 128>}]} {
    %c0 = arith.constant 0 : index
    %c0_0 = arith.constant 0 : index
    %0 = vector.load %arg2[%c0, %c0_0] : memref<40x2xf32, #tpu.memory_space<vmem>>, vector<40x2xf32>
    %c0_1 = arith.constant 0 : index
    %c0_2 = arith.constant 0 : index
    %1 = vector.load %arg3[%c0_1, %c0_2] : memref<40x1xf32, #tpu.memory_space<vmem>>, vector<40x1xf32>
    %c0_3 = arith.constant 0 : index
    %c0_4 = arith.constant 0 : index
    %2 = vector.load %arg4[%c0_3, %c0_4] : memref<40x40xf32, #tpu.memory_space<vmem>>, vector<40x40xf32>
    %c0_5 = arith.constant 0 : index
    %c0_6 = arith.constant 0 : index
    %3 = vector.load %arg5[%c0_5, %c0_6] : memref<40x1xf32, #tpu.memory_space<vmem>>, vector<40x1xf32>
    %c0_7 = arith.constant 0 : index
    %c0_8 = arith.constant 0 : index
    %4 = vector.load %arg6[%c0_7, %c0_8] : memref<40x1xf32, #tpu.memory_space<vmem>>, vector<40x1xf32>
    %c0_9 = arith.constant 0 : index
    %c0_10 = arith.constant 0 : index
    %5 = vector.load %arg7[%c0_9, %c0_10] : memref<1x1xf32, #tpu.memory_space<vmem>>, vector<1x1xf32>
    %c0_i32 = arith.constant 0 : i32
    %c128_i32 = arith.constant 128 : i32
    %6 = arith.muli %c0_i32, %c128_i32 : i32
    %7 = tpu.assume_multiple %6, 128 : i32
    %c0_11 = arith.constant 0 : index
    %8 = arith.index_cast %7 : i32 to index
    %9 = vector.load %arg1[%c0_11, %8] : memref<2x128xf32, #tpu.memory_space<vmem>>, vector<2x128xf32>
    %10 = vector.extract_strided_slice %9 {offsets = [0, 0], sizes = [1, 128], strides = [1, 1]} : vector<2x128xf32> to vector<1x128xf32>
    %11 = vector.extract_strided_slice %9 {offsets = [1, 0], sizes = [1, 128], strides = [1, 1]} : vector<2x128xf32> to vector<1x128xf32>
    %cst = arith.constant 1.000000e+00 : f32
    %12 = vector.broadcast %cst : f32 to vector<1x128xf32>
    %13 = arith.subf %12, %10 : vector<1x128xf32>
    %14 = arith.mulf %10, %13 : vector<1x128xf32>
    %15 = arith.mulf %14, %11 : vector<1x128xf32>
    %cst_12 = arith.constant 1.000000e+00 : f32
    %16 = vector.broadcast %cst_12 : f32 to vector<1x128xf32>
    %17 = arith.subf %16, %11 : vector<1x128xf32>
    %18 = arith.mulf %15, %17 : vector<1x128xf32>
    %19 = vector.extract_strided_slice %0 {offsets = [0, 0], sizes = [40, 1], strides = [1, 1]} : vector<40x2xf32> to vector<40x1xf32>
    %20 = vector.extract_strided_slice %9 {offsets = [0, 0], sizes = [1, 128], strides = [1, 1]} : vector<2x128xf32> to vector<1x128xf32>
    %21 = vector.broadcast %19 : vector<40x1xf32> to vector<40x128xf32>
    %22 = vector.broadcast %20 : vector<1x128xf32> to vector<40x128xf32>
    %23 = arith.mulf %21, %22 : vector<40x128xf32>
    %24 = vector.broadcast %1 : vector<40x1xf32> to vector<40x128xf32>
    %25 = arith.addf %24, %23 : vector<40x128xf32>
    %26 = vector.extract_strided_slice %0 {offsets = [0, 1], sizes = [40, 1], strides = [1, 1]} : vector<40x2xf32> to vector<40x1xf32>
    %27 = vector.extract_strided_slice %9 {offsets = [1, 0], sizes = [1, 128], strides = [1, 1]} : vector<2x128xf32> to vector<1x128xf32>
    %28 = vector.broadcast %26 : vector<40x1xf32> to vector<40x128xf32>
    %29 = vector.broadcast %27 : vector<1x128xf32> to vector<40x128xf32>
    %30 = arith.mulf %28, %29 : vector<40x128xf32>
    %31 = arith.addf %25, %30 : vector<40x128xf32>
    %cst_13 = arith.constant 0.000000e+00 : f32
    %32 = vector.broadcast %cst_13 : f32 to vector<40x128xf32>
    %33 = arith.maximumf %31, %32 : vector<40x128xf32>
    %cst_14 = arith.constant dense<0.000000e+00> : vector<40x128xf32>
    %34 = tpu.matmul %2, %33, %cst_14 {dimension_numbers = #tpu.dot_dimension_numbers<[1], [0], [0], [1], [0, 0, 1, 1], [], []>} : vector<40x40xf32>, vector<40x128xf32>, vector<40x128xf32> -> vector<40x128xf32>
    %35 = vector.broadcast %3 : vector<40x1xf32> to vector<40x128xf32>
    %36 = arith.addf %34, %35 : vector<40x128xf32>
    %cst_15 = arith.constant 0.000000e+00 : f32
    %37 = vector.broadcast %cst_15 : f32 to vector<40x128xf32>
    %38 = arith.maximumf %36, %37 : vector<40x128xf32>
    %39 = vector.broadcast %4 : vector<40x1xf32> to vector<40x128xf32>
    %40 = arith.mulf %39, %38 : vector<40x128xf32>
    %cst_16 = arith.constant dense<0.000000e+00> : vector<128xf32>
    %41 = vector.multi_reduction <add>, %40, %cst_16 [0] : vector<40x128xf32> to vector<128xf32>
    %42 = vector.shape_cast %41 : vector<128xf32> to vector<1x128xf32>
    %43 = vector.broadcast %5 : vector<1x1xf32> to vector<1x128xf32>
    %44 = arith.addf %42, %43 : vector<1x128xf32>
    %45 = arith.mulf %18, %44 : vector<1x128xf32>
    %c0_17 = arith.constant 0 : index
    %46 = arith.index_cast %7 : i32 to index
    %47 = vector.load %arg8[%c0_17, %46] : memref<1x128xf32, #tpu.memory_space<vmem>>, vector<1x128xf32>
    tpu.vector_store %arg8[%c0_17, %46], %45 {strides = array<i32>} : memref<1x128xf32, #tpu.memory_space<vmem>>, vector<1x128xf32>,
    %c1_i32 = arith.constant 1 : i32
    return
  }
  func.func @transform_0(%arg0: i32) -> (i32, i32) {
    %c0_i32 = arith.constant 0 : i32
    %c0_i32_0 = arith.constant 0 : i32
    return %c0_i32, %arg0 : i32, i32
  }
  func.func @transform_1(%arg0: i32) -> (i32, i32) {
    %c0_i32 = arith.constant 0 : i32
    %c0_i32_0 = arith.constant 0 : i32
    %c0_i32_1 = arith.constant 0 : i32
    return %c0_i32, %c0_i32_0 : i32, i32
  }
  func.func @transform_2(%arg0: i32) -> (i32, i32) {
    %c0_i32 = arith.constant 0 : i32
    %c0_i32_0 = arith.constant 0 : i32
    %c0_i32_1 = arith.constant 0 : i32
    return %c0_i32, %c0_i32_0 : i32, i32
  }
  func.func @transform_3(%arg0: i32) -> (i32, i32) {
    %c0_i32 = arith.constant 0 : i32
    %c0_i32_0 = arith.constant 0 : i32
    %c0_i32_1 = arith.constant 0 : i32
    return %c0_i32, %c0_i32_0 : i32, i32
  }
  func.func @transform_4(%arg0: i32) -> (i32, i32) {
    %c0_i32 = arith.constant 0 : i32
    %c0_i32_0 = arith.constant 0 : i32
    %c0_i32_1 = arith.constant 0 : i32
    return %c0_i32, %c0_i32_0 : i32, i32
  }
  func.func @transform_5(%arg0: i32) -> (i32, i32) {
    %c0_i32 = arith.constant 0 : i32
    %c0_i32_0 = arith.constant 0 : i32
    %c0_i32_1 = arith.constant 0 : i32
    return %c0_i32, %c0_i32_0 : i32, i32
  }
  func.func @transform_6(%arg0: i32) -> (i32, i32) {
    %c0_i32 = arith.constant 0 : i32
    %c0_i32_0 = arith.constant 0 : i32
    %c0_i32_1 = arith.constant 0 : i32
    return %c0_i32, %c0_i32_0 : i32, i32
  }
  func.func @transform_7(%arg0: i32) -> (i32, i32) {
    %c0_i32 = arith.constant 0 : i32
    %c0_i32_0 = arith.constant 0 : i32
    return %c0_i32, %arg0 : i32, i32
  }
}

</mosaic_0001>

<bundles_post_ra>
// kernel: hard_mlp.1
= control target key start
LH: loop header
LB: loop body
LE: loop exit
PB: predicated region body
PF: predicated region fallthrough
CT: control target
= control target key end

     0   :  { %v427_v0 = vmov 0   ;;  %v428_v6 = vmov 1   ;;  %v429_v11 = vmov 0.0|0.0   ;;  %vm430_vm0 = vmmov 0   ;;  %s587_s2 = inlined_call_operand.vmem [shape: f32[40,1], index: 2, kind: input, shape index: {}]   ;;  %s588_s1 = inlined_call_operand.vmem [shape: f32[40,2], index: 1, kind: input, shape index: {}]   ;;  %s589_s4 = inlined_call_operand.vmem [shape: f32[40,1], index: 4, kind: input, shape index: {}]   ;;  %s590_s5 = inlined_call_operand.vmem [shape: f32[40,1], index: 5, kind: input, shape index: {}]   ;;  %s591_s6 = inlined_call_operand.<no memory space> [shape: f32[1,1], index: 6, kind: input, shape index: {}]   ;;  %s592_s0 = inlined_call_operand.vmem [shape: f32[2,128], index: 0, kind: input, shape index: {}]   ;;  %s593_s3 = inlined_call_operand.vmem [shape: f32[40,40], index: 3, kind: input, shape index: {}]   ;;  %s594_s7 = inlined_call_operand.vmem [shape: f32[1,128], index: 7, kind: output, shape index: {}]  }
   0x1   :  { %418 = vset.pattern.permute.xlu1 %v427_v0  ;;  %417 = vset.pattern.permute.xlu0 %v427_v0  ;;  %v33_v1 = vld [vmem:[%s587_s2] sm:$0xff]  ;;  %v34_v3 = vld [vmem:[%s587_s2 + $0x8] sm:$0xff]  ;;  %v31_v5 = vld [vmem:[%s588_s1 + $0x18] sm:$0xff]  ;;  %v431_v18 = vmov 0.0   ;;  %v12_v20 = vstv %s591_s6  ;;  %v90_v26 = vlaneseq  ;;  %vm193_vm1 = vcmask 326656  }
   0x2   :  { %v28_v2 = vld [vmem:[%s588_s1] sm:$0xff]  ;;  %101 = vperm.xlu1 %418, %v33_v1   ;;  %v29_v4 = vld [vmem:[%s588_s1 + $0x8] sm:$0xff]  ;;  %v30_v7 = vld [vmem:[%s588_s1 + $0x10] sm:$0xff]  ;;  %400 = vmatprep.subr.bf16.mxu0 %v429_v11  ;;  %13 = vst [vmem:[#allocation2] sm:$0x1] %v12_v20 }
   0x3   :  { %67 = vperm.xlu0 %417, %v28_v2   ;;  %v35_v8 = vld [vmem:[%s587_s2 + $0x10] sm:$0xff]  ;;  %v36_v9 = vld [vmem:[%s587_s2 + $0x18] sm:$0xff]  ;;  %v37_v10 = vld [vmem:[%s587_s2 + $0x20] sm:$0xff]  ;;  %406 = vmatprep.subr.bf16.mxu1 %v429_v11  ;;  %v541_v27 = vshrl.u32 %v90_v26, 7 }
   0x4   :  { %v44_v12 = vld [vmem:[%s589_s4 + $0x8] sm:$0xff]  ;;  %v46_v13 = vld [vmem:[%s589_s4 + $0x18] sm:$0xff]  ;;  %v32_v14 = vld [vmem:[%s588_s1 + $0x20] sm:$0xff]  ;;  %385 = vmatprep.mubr.msk.f32.mxu0 %vm430_vm0, %v431_v18  ;;  %394 = vmatprep.mubr.msk.f32.mxu1 %vm430_vm0, %v431_v18 }
   0x5   :  { %v49_v15 = vld [vmem:[%s590_s5 + $0x8] sm:$0xff]  ;;  %v50_v16 = vld [vmem:[%s590_s5 + $0x10] sm:$0xff]  ;;  %v52_v17 = vld [vmem:[%s590_s5 + $0x20] sm:$0xff]  ;;  %v92_v30 = vsub.s32 0, %v541_v27  ;;  %v151_v31 = vsub.s32 1, %v541_v27 }
   0x6   :  { %106 = vperm.xlu1 %418, %v34_v3   ;;  %v43_v19 = vld [vmem:[%s589_s4] sm:$0xff]  ;;  %v45_v21 = vld [vmem:[%s589_s4 + $0x10] sm:$0xff]  ;;  %v51_v24 = vld [vmem:[%s590_s5 + $0x18] sm:$0xff] }
   0x7   :  { %72 = vperm.xlu0 %417, %v29_v4   ;;  %v48_v22 = vld [vmem:[%s590_s5] sm:$0xff] }
   0x8   :  { %v47_v23 = vld [vmem:[%s589_s4 + $0x20] sm:$0xff] }
   0x9   :  { %v53_v25 = vld [vmem:[#allocation2] sm:$0x1] }
   0xa   :  { %419 = vset.pattern.permute.xlu1 %v428_v6  ;;  %v548_v32 = vld [vmem:[%s592_s0] sm:$0x3] }
   0xb   :  { %82 = vperm.xlu0 %417, %v31_v5   ;;  %134 = vperm.xlu1 %419, %v29_v4   ;;  %v93_v35 = vrot.slane %v548_v32, %v92_v30  ;;  %v152_v36 = vrot.slane %v548_v32, %v151_v31 }
   0xf   :  { %421 = vset.pattern.permute.xlu0 %v428_v6  ;;  %420 = vset.pattern.permute.xlu1 %v427_v0 }
  0x10   :  { %130 = vperm.xlu0 %421, %v28_v2   ;;  %77 = vperm.xlu1 %420, %v30_v7  }
  0x14   :  { %138 = vperm.xlu0 %421, %v30_v7   ;;  %111 = vperm.xlu1 %420, %v35_v8  }
  0x18   :  { %424 = vset.pattern.permute.xlu0 %v427_v0  ;;  %116 = vperm.xlu1 %420, %v36_v9  }
  0x19   :  { %121 = vperm.xlu0 %424, %v37_v10  }
  0x1c   :  { %422 = vset.pattern.permute.xlu1 %v428_v6 }
  0x1d   :  { %175 = vperm.xlu0 %424, %v44_v12   ;;  %142 = vperm.xlu1 %422, %v31_v5   ;;  %v41_v12 = vld [vmem:[%s593_s3 + $0x18] sm:$0xff] }
  0x21   :  { %185 = vperm.xlu0 %424, %v46_v13   ;;  %423 = vset.pattern.permute.xlu1 %v427_v0  ;;  %v39_v13 = vld [vmem:[%s593_s3 + $0x8] sm:$0xff] }
  0x22   :  { %87 = vperm.xlu1 %423, %v32_v14  }
  0x25   :  { %311 = vperm.xlu0 %424, %v49_v15   ;;  %v40_v15 = vld [vmem:[%s593_s3 + $0x10] sm:$0xff] }
  0x26   :  { %425 = vset.pattern.permute.xlu1 %v428_v6 }
  0x27   :  { %146 = vperm.xlu1 %425, %v32_v14   ;;  %v42_v14 = vld [vmem:[%s593_s3 + $0x20] sm:$0xff] }
  0x29   :  { %316 = vperm.xlu0 %424, %v50_v16  }
  0x2b   :  { %426 = vset.pattern.permute.xlu1 %v427_v0 }
  0x2c   :  { %170 = vperm.xlu1 %426, %v43_v19  }
  0x2d   :  { %326 = vperm.xlu0 %424, %v52_v17  }
  0x30   :  { %180 = vperm.xlu1 %426, %v45_v21  }
  0x34   :  { %306 = vperm.xlu1 %426, %v48_v22  }
  0x38   :  { %190 = vperm.xlu1 %426, %v47_v23  }
  0x3c   :  { %321 = vperm.xlu1 %426, %v51_v24  }
  0x40   :  { %346 = vperm.xlu1 %426, %v53_v25  }
  0x81   :  { %v102_v28 = vpop.permute.xlu1 %101 }
  0x82   :  { %v68_v29 = vpop.permute.xlu0 %67 }
  0x83   :  { %v94_v40 = vmul.f32 %v93_v35, %v68_v29 }
  0x85   :  { %v107_v33 = vpop.permute.xlu1 %106  ;;  %v124_v44 = vadd.f32 %v102_v28, %v94_v40 }
  0x86   :  { %v73_v34 = vpop.permute.xlu0 %72 }
  0x87   :  { %v95_v37 = vmul.f32 %v93_v35, %v73_v34 }
  0x89   :  { %v125_v42 = vadd.f32 %v107_v33, %v95_v37 }
  0x8a   :  { %v83_v38 = vpop.permute.xlu0 %82  ;;  %v135_v39 = vpop.permute.xlu1 %134 }
  0x8b   :  { %v154_v41 = vmul.f32 %v152_v36, %v135_v39  ;;  %v97_v58 = vmul.f32 %v93_v35, %v83_v38 }
  0x8d   :  { %v159_v45 = vadd.f32 %v154_v41, %v125_v42 }
  0x8f   :  { %v131_v43 = vpop.permute.xlu0 %130  ;;  %v78_v47 = vpop.permute.xlu1 %77  ;;  %v164_v49 = vmax.f32 %v159_v45, 0.0 }
  0x90   :  { %v153_v46 = vmul.f32 %v152_v36, %v131_v43  ;;  %v96_v54 = vmul.f32 %v93_v35, %v78_v47 }
  0x92   :  { %v158_v48 = vadd.f32 %v153_v46, %v124_v44 }
  0x93   :  { %v112_v51 = vpop.permute.xlu1 %111  ;;  %v139_v53 = vpop.permute.xlu0 %138 }
  0x94   :  { %v163_v50 = vmax.f32 %v158_v48, 0.0  ;;  %v126_v56 = vadd.f32 %v112_v51, %v96_v54  ;;  %v155_v57 = vmul.f32 %v152_v36, %v139_v53 }
  0x96   :  { %v401_v52 = vpack.c.bf16 %v164_v49, %v163_v50  ;;  %v160_v60 = vadd.f32 %v155_v57, %v126_v56  ;;  %v55_v57 = vsub.f32 1.0, %v548_v32 }
  0x97   :  { %v117_v55 = vpop.permute.xlu1 %116 }
  0x98   :  { %402 = vmatpush3.bf16.msra.mxu0 %v401_v52  ;;  %409 = vmatpush3.bf16.msra.mxu1 %v401_v52  ;;  %v127_v61 = vadd.f32 %v117_v55, %v97_v58  ;;  %v165_v0 = vmax.f32 %v160_v60, 0.0  ;;  %v122_v5 = vpop.permute.xlu0 %121  ;;  %v56_v60 = vmul.f32 %v55_v57, %v548_v32 }
  0x99   :  { %403 = vmatprep.subr.bf16.mxu0 %v429_v11  ;;  %407 = vmatprep.subr.bf16.mxu1 %v429_v11  ;;  %v38_v11 = vld [vmem:[%s593_s3] sm:$0xff] }
  0x9c   :  { %v143_v59 = vpop.permute.xlu1 %142  ;;  %v176_v17 = vpop.permute.xlu0 %175 }
  0x9d   :  { %v156_v62 = vmul.f32 %v152_v36, %v143_v59 }
  0x9f   :  { %v161_v63 = vadd.f32 %v156_v62, %v127_v61  ;;  %v58_v61 = vrot.slane %v548_v32, 1 }
  0xa0   :  { %v186_v20 = vpop.permute.xlu0 %185 }
  0xa1   :  { %v166_v1 = vmax.f32 %v161_v63, 0.0  ;;  %v88_v2 = vpop.permute.xlu1 %87 }
  0xa2   :  { %v98_v3 = vmul.f32 %v93_v35, %v88_v2 }
  0xa3   :  { %v404_v4 = vpack.c.bf16 %v166_v1, %v165_v0  ;;  %v60_v0 = vmul.f32 %v58_v61, %v56_v60  ;;  %v62_v1 = vrot.slane %v55_v57, 1 }
  0xa4   :  { %v128_v7 = vadd.f32 %v122_v5, %v98_v3  ;;  %v312_v28 = vpop.permute.xlu0 %311 }
  0xa5   :  { %405 = vmatpush3.bf16.msra.mxu0 %v404_v4  ;;  %410 = vmatpush3.bf16.msra.mxu1 %v404_v4 }
  0xa6   :  { %v147_v6 = vpop.permute.xlu1 %146  ;;  %383 = vmatprep.subr.mxu0 %v431_v18  ;;  %408 = vmatprep.subr.mxu1 %v431_v18 }
  0xa7   :  { %v157_v8 = vmul.f32 %v152_v36, %v147_v6  ;;  %v64_v6 = vmul.f32 %v62_v1, %v60_v0 }
  0xa8   :  { %v317_v45 = vpop.permute.xlu0 %316 }
  0xa9   :  { %v162_v9 = vadd.f32 %v157_v8, %v128_v7 }
  0xab   :  { %v167_v10 = vmax.f32 %v162_v9, 0.0  ;;  %v171_v16 = vpop.permute.xlu1 %170 }
  0xac   :  { %v327_v54 = vpop.permute.xlu0 %326 }
  0xad   :  { %384 = vmatpush3.msra.mxu0 %v167_v10  ;;  %411 = vmatpush3.msra.mxu1 %v167_v10 }
  0xae   :  { %386 = vmatmul.mubr.msk.f32.vlgmr.msra.gmra.mrb[0].mxu0 %vm193_vm1, %v38_v11  ;;  %395 = vmatmul.mubr.msk.f32.vlgmr.msra.gmra.mrb[0].mxu1 %vm193_vm1, %v41_v12 }
  0xaf   :  { %388 = vmatprep.mubr.msk.f32.mxu0 %vm430_vm0, %v431_v18  ;;  %397 = vmatprep.mubr.msk.f32.mxu1 %vm430_vm0, %v431_v18  ;;  %v181_v19 = vpop.permute.xlu1 %180 }
  0xb2   :  { %389 = vmatmul.mubr.msk.f32.gmra.mrb[2].mxu0 %vm193_vm1, %v39_v13  ;;  %398 = vmatmul.mubr.msk.f32.gmra.mrb[2].mxu1 %vm193_vm1, %v42_v14 }
  0xb3   :  { %391 = vmatprep.mubr.msk.f32.mxu0 %vm430_vm0, %v431_v18  ;;  %v307_v26 = vpop.permute.xlu1 %306 }
  0xb6   :  { %392 = vmatmul.mubr.msk.f32.gmra.mrb[4].mxu0 %vm193_vm1, %v40_v15 }
  0xb7   :  { %v191_v38 = vpop.permute.xlu1 %190 }
  0xbb   :  { %v322_v51 = vpop.permute.xlu1 %321 }
  0xbf   :  { %v347_v3 = vpop.permute.xlu1 %346 }
  0xc0   :  { %v352_v5 = vrot.slane %v347_v3, %v92_v30 }
 0x181   :  { %v275_v21 = vpop.f32.mrb[0].mxu0  ;;  %v290_v22 = vpop.f32.mrb[0].mxu1 }
 0x182   :  { %v276_v23 = vadd.f32 %v275_v21, %v171_v16  ;;  %v387_v24 = vpop.f32.mrb[1].mxu0  ;;  %v396_v25 = vpop.f32.mrb[1].mxu1  ;;  %v291_v36 = vadd.f32 %v290_v22, %v186_v20 }
 0x184   :  { %v299_v33 = vmax.f32 %v276_v23, 0.0  ;;  %v302_v46 = vmax.f32 %v291_v36, 0.0 }
 0x185   :  { %v280_v29 = vpop.f32.mrb[2].mxu0  ;;  %v295_v31 = vpop.f32.mrb[2].mxu1 }
 0x186   :  { %v281_v18 = vadd.f32 %v280_v29, %v176_v17  ;;  %v390_v34 = vpop.f32.mrb[3].mxu0  ;;  %v399_v35 = vpop.f32.mrb[3].mxu1  ;;  %v329_v40 = vmul.f32 %v307_v26, %v299_v33  ;;  %v296_v42 = vadd.f32 %v295_v31, %v191_v38  ;;  %v332_v52 = vmul.f32 %v322_v51, %v302_v46 }
 0x188   :  { %v300_v37 = vmax.f32 %v281_v18, 0.0  ;;  %v303_v49 = vmax.f32 %v296_v42, 0.0 }
 0x189   :  { %v285_v39 = vpop.f32.mrb[4].mxu0 }
 0x18a   :  { %v330_v41 = vmul.f32 %v312_v28, %v300_v37  ;;  %v286_v43 = vadd.f32 %v285_v39, %v181_v19  ;;  %v393_v44 = vpop.f32.mrb[5].mxu0  ;;  %v333_v55 = vmul.f32 %v327_v54, %v303_v49 }
 0x18c   :  { %v334_v47 = vadd.f32 %v330_v41, %v329_v40  ;;  %v301_v48 = vmax.f32 %v286_v43, 0.0 }
 0x18e   :  { %v331_v50 = vmul.f32 %v317_v45, %v301_v48 }
 0x190   :  { %v335_v53 = vadd.f32 %v334_v47, %v331_v50 }
 0x192   :  { %v336_v56 = vadd.f32 %v335_v53, %v332_v52 }
 0x194   :  { %v337_v58 = vadd.f32 %v336_v56, %v333_v55 }
 0x196   :  { %v338_v59 = vrot.slane %v337_v58, 4 }
 0x198   :  { %v339_v62 = vadd.f32 %v338_v59, %v337_v58 }
 0x19a   :  { %v340_v63 = vrot.slane %v339_v62, 2 }
 0x19c   :  { %v341_v2 = vadd.f32 %v340_v63, %v339_v62 }
 0x19e   :  { %v342_v4 = vrot.slane %v341_v2, 1 }
 0x1a0   :  { %v343_v7 = vadd.f32 %v342_v4, %v341_v2 }
 0x1a2   :  { %v353_v8 = vadd.f32 %v352_v5, %v343_v7 }
 0x1a4   :  { %v354_v9 = vmul.f32 %v353_v8, %v64_v6 }
 0x1a6   :  { %355 = vst [vmem:[%s594_s7] sm:$0x1] %v354_v9 }

</bundles_post_ra>
